<compile_context>
chip_gen: v5e
topology: v5e:2x2
jax: 0.10.0
libtpu: 0.0.40
codegen_flags: <defaults>
</compile_context>

<pallas_src>
import numpy as np
import jax
import jax.numpy as jnp
from jax import lax
from jax.experimental import pallas as pl
from jax.experimental.pallas import tpu as pltpu

N_OBJ = 5  # n_objectives


def _build_jacob_kernel(int_cols, gamma):
    """Returns a kernel closure with the static Jacob config baked in.

    int_cols : python list of column indices whose value_type == 'int'
    gamma    : python float, RBF gamma = 1/(2*lengthscale^2)
    """
    int_cols = tuple(int(c) for c in int_cols)
    neg_gamma = -float(gamma)

    def kernel(x_ref, norm_ref, xt_ref, w_ref, o_ref):
        """
        x_ref    : [N, D]       raw proposals
        norm_ref : [2, D]       row 0 = min_list, row 1 = 1/(max-min)
        xt_ref   : [D, M]       GP training inputs, transposed
        w_ref    : [M_pad+D, 5] fused weights: rows [0,M) = alpha in col 0,
                                rows [M_pad, M_pad+D) = -1 permutation of cfg
        o_ref    : [N, 5]       stacked objective vectors
        """
        D = x_ref.shape[1]
        M = xt_ref.shape[1]
        m_pad = w_ref.shape[0] - D

        x = x_ref[...]                                            # [N, D]

        # Python int() truncates toward zero for 'int' value_type params.
        truncd = jnp.where(x >= 0.0, jnp.floor(x), jnp.ceil(x))
        if int_cols:
            col = lax.broadcasted_iota(jnp.int32, (1, D), 1)      # [1, D]
            mask = col == int_cols[0]
            for c in int_cols[1:]:
                mask = jnp.logical_or(mask, col == c)
            cfg = jnp.where(mask, truncd, x)                      # [N, D]
        else:
            cfg = x

        # GP input normalization: (cfg - min) * 1/(max - min).
        lo = norm_ref[0:1, :]                                     # [1, D]
        invr = norm_ref[1:2, :]                                   # [1, D]
        z = (cfg - lo) * invr                                     # [N, D]

        # Squared distances via the matmul trick (MXU) + row/col norms (VPU).
        xt = xt_ref[...]                                          # [D, M]
        cross = jnp.dot(z, xt, preferred_element_type=jnp.float32)    # [N, M]
        z2 = jnp.sum(z * z, axis=-1, keepdims=True)                    # [N, 1]
        t2 = jnp.sum(xt * xt, axis=0, keepdims=True)                   # [1, M]
        sq = jnp.maximum(z2 + t2 - 2.0 * cross, 0.0)                   # [N, M]

        k = jnp.exp(neg_gamma * sq)                               # RBF kernel

        # Fused output: peak (k @ W_k with alpha in objective column 0) plus
        # the negated / permuted cfg columns (cfg @ W_c).  One store, no
        # cross-lane concatenation of single-lane slices.
        o_ref[...] = (
            jnp.dot(k, w_ref[0:M, :], preferred_element_type=jnp.float32)
            + jnp.dot(cfg, w_ref[m_pad:m_pad + D, :],
                      preferred_element_type=jnp.float32))

    return kernel


def jacob_forward(x, is_int, lo, hi, x_train, alpha, gamma):
    """Pallas wrapper equivalent to Jacob.forward."""
    N, D = x.shape
    M = x_train.shape[0]
    assert D == 4, "Jacob has exactly [temperature, ResidenceTime, eqEster, eqAmmonia]"

    # Static config -> baked into the kernel (no tiny operand DMAs / SMEM).
    is_int_h = np.asarray(jax.device_get(is_int), np.float32).reshape(D)
    int_cols = [i for i in range(D) if is_int_h[i] > 0.5]
    kernel = _build_jacob_kernel(int_cols, float(gamma))

    # Packed normalization constants: [2, D] = [min ; 1/(max-min)].
    lo_h = np.asarray(jax.device_get(lo), np.float32).reshape(1, D)
    hi_h = np.asarray(jax.device_get(hi), np.float32).reshape(1, D)
    norm = jnp.asarray(np.concatenate([lo_h, 1.0 / (hi_h - lo_h)], axis=0))

    xt = jnp.asarray(x_train, jnp.float32).T                      # [D, M]

    # Fused weight matrix:
    #   rows [0, M)            : GP dual weights alpha in objective column 0
    #   rows [M, M_pad)        : zero padding (sublane alignment)
    #   rows [M_pad, M_pad+D)  : -1 permutation placing cfg columns
    #                            [2, 3, 0, 1] into objective columns 1..4
    m_pad = -(-M // 8) * 8
    w_h = np.zeros((m_pad + D, N_OBJ), np.float32)
    w_h[:M, 0] = np.asarray(jax.device_get(alpha), np.float32).reshape(M)
    w_h[m_pad + 2, 1] = -1.0   # eqEster       -> objective 1
    w_h[m_pad + 3, 2] = -1.0   # eqAmmonia     -> objective 2
    w_h[m_pad + 0, 3] = -1.0   # temperature   -> objective 3
    w_h[m_pad + 1, 4] = -1.0   # ResidenceTime -> objective 4
    w = jnp.asarray(w_h)

    return pl.pallas_call(
        kernel,
        out_shape=jax.ShapeDtypeStruct((N, N_OBJ), jnp.float32),
        in_specs=[pl.BlockSpec(memory_space=pltpu.MemorySpace.VMEM)] * 4,
        out_specs=pl.BlockSpec(memory_space=pltpu.MemorySpace.VMEM),
    )(jnp.asarray(x, jnp.float32), norm, xt, w)


def jacob_ref(x, is_int, lo, hi, x_train, alpha, gamma):
    """Pure-JAX reference of Jacob.forward (for correctness check)."""
    truncd = jnp.where(x >= 0.0, jnp.floor(x), jnp.ceil(x))
    cfg = jnp.where(is_int[None, :] > 0.5, truncd, x)
    z = (cfg - lo[None, :]) / (hi[None, :] - lo[None, :])
    sq = jnp.sum((z[:, None, :] - x_train[None, :, :]) ** 2, axis=-1)
    peak = jnp.exp(-gamma * sq) @ alpha
    return jnp.stack(
        [peak, -cfg[:, 2], -cfg[:, 3], -cfg[:, 0], -cfg[:, 1]], axis=1)


if __name__ == "__main__":
    # --- synthetic, deterministic "Jacob" configuration --------------------
    params = [
        {"name": "temperature",   "value_type": "int",   "bounds": (30.0, 100.0)},
        {"name": "ResidenceTime", "value_type": "float", "bounds": (1.0, 10.0)},
        {"name": "eqEster",       "value_type": "float", "bounds": (1.0, 5.0)},
        {"name": "eqAmmonia",     "value_type": "float", "bounds": (1.0, 10.0)},
    ]
    D = len(params)                 # dim = 4
    N = 8                           # number of proposals (x.shape[0])
    M = 16                          # synthetic GP training points

    lo = jnp.array([p["bounds"][0] for p in params], jnp.float32)   # min_list
    hi = jnp.array([p["bounds"][1] for p in params], jnp.float32)   # max_list
    is_int = jnp.array([1.0 if p["value_type"] == "int" else 0.0
                        for p in params], jnp.float32)

    key = jax.random.PRNGKey(0)
    k_x, k_train, k_alpha = jax.random.split(key, 3)

    # proposals inside the bounds
    u = jax.random.uniform(k_x, (N, D), dtype=jnp.float32)
    x = lo[None, :] + u * (hi - lo)[None, :]

    # deterministic synthetic GP ("model()")
    x_train = jax.random.uniform(k_train, (M, D), dtype=jnp.float32)
    alpha = jax.random.normal(k_alpha, (M,), dtype=jnp.float32)
    lengthscale = 0.5
    gamma = 1.0 / (2.0 * lengthscale * lengthscale)

    # --- run Pallas kernel and verify ---------------------------------------
    out = jacob_forward(x, is_int, lo, hi, x_train, alpha, gamma)
    out = jax.block_until_ready(out)

    ref = jacob_ref(x, is_int, lo, hi, x_train, alpha, gamma)
    assert out.shape == (N, N_OBJ)
    assert jnp.allclose(out, ref, rtol=1e-4, atol=1e-4), (out, ref)

    print("KERNEL_OK")
</pallas_src>

<mosaic_0001>
module attributes {stable_mosaic.version = 11 : i64} {
  func.func @kernel(%arg0: memref<8x4xf32, #tpu.memory_space<vmem>>, %arg1: memref<2x4xf32, #tpu.memory_space<vmem>>, %arg2: memref<4x16xf32, #tpu.memory_space<vmem>>, %arg3: memref<20x5xf32, #tpu.memory_space<vmem>>, %arg4: memref<8x5xf32, #tpu.memory_space<vmem>>) attributes {dimension_semantics = [], scalar_prefetch = 0 : i64, scratch_operands = 0 : i64, tpu.core_type = #tpu.core_type<tc>} {
    %c0 = arith.constant 0 : index
    %c0_0 = arith.constant 0 : index
    %0 = vector.load %arg0[%c0, %c0_0] : memref<8x4xf32, #tpu.memory_space<vmem>>, vector<8x4xf32>
    %cst = arith.constant 0.000000e+00 : f32
    %1 = vector.broadcast %cst : f32 to vector<8x4xf32>
    %2 = arith.cmpf oge, %0, %1 : vector<8x4xf32>
    %3 = math.floor %0 : vector<8x4xf32>
    %4 = math.ceil %0 : vector<8x4xf32>
    %5 = arith.select %2, %3, %4 : vector<8x4xi1>, vector<8x4xf32>
    %6 = tpu.iota {dimensions = array<i32: 1>} : vector<1x4xi32>
    %c0_i32 = arith.constant 0 : i32
    %7 = vector.broadcast %c0_i32 : i32 to vector<1x4xi32>
    %8 = arith.cmpi eq, %6, %7 : vector<1x4xi32>
    %9 = vector.shape_cast %8 : vector<1x4xi1> to vector<1x4xi1>
    %10 = vector.broadcast %9 : vector<1x4xi1> to vector<8x4xi1>
    %11 = arith.select %10, %5, %0 : vector<8x4xi1>, vector<8x4xf32>
    %c0_1 = arith.constant 0 : index
    %c0_2 = arith.constant 0 : index
    %12 = vector.load %arg1[%c0_1, %c0_2] : memref<2x4xf32, #tpu.memory_space<vmem>>, vector<1x4xf32>
    %c1 = arith.constant 1 : index
    %c0_3 = arith.constant 0 : index
    %13 = vector.load %arg1[%c1, %c0_3] : memref<2x4xf32, #tpu.memory_space<vmem>>, vector<1x4xf32>
    %14 = vector.broadcast %12 : vector<1x4xf32> to vector<8x4xf32>
    %15 = arith.subf %11, %14 : vector<8x4xf32>
    %16 = vector.broadcast %13 : vector<1x4xf32> to vector<8x4xf32>
    %17 = arith.mulf %15, %16 : vector<8x4xf32>
    %c0_4 = arith.constant 0 : index
    %c0_5 = arith.constant 0 : index
    %18 = vector.load %arg2[%c0_4, %c0_5] : memref<4x16xf32, #tpu.memory_space<vmem>>, vector<4x16xf32>
    %cst_6 = arith.constant dense<0.000000e+00> : vector<8x16xf32>
    %19 = tpu.matmul %17, %18, %cst_6 {dimension_numbers = #tpu.dot_dimension_numbers<[1], [0], [0], [1], [0, 0, 1, 1], [], []>} : vector<8x4xf32>, vector<4x16xf32>, vector<8x16xf32> -> vector<8x16xf32>
    %20 = arith.mulf %17, %17 : vector<8x4xf32>
    %cst_7 = arith.constant dense<0.000000e+00> : vector<8xf32>
    %21 = vector.multi_reduction <add>, %20, %cst_7 [1] : vector<8x4xf32> to vector<8xf32>
    %22 = vector.shape_cast %21 : vector<8xf32> to vector<8x1xf32>
    %23 = arith.mulf %18, %18 : vector<4x16xf32>
    %cst_8 = arith.constant dense<0.000000e+00> : vector<16xf32>
    %24 = vector.multi_reduction <add>, %23, %cst_8 [0] : vector<4x16xf32> to vector<16xf32>
    %25 = vector.shape_cast %24 : vector<16xf32> to vector<1x16xf32>
    %26 = vector.broadcast %22 : vector<8x1xf32> to vector<8x16xf32>
    %27 = vector.broadcast %25 : vector<1x16xf32> to vector<8x16xf32>
    %28 = arith.addf %26, %27 : vector<8x16xf32>
    %cst_9 = arith.constant 2.000000e+00 : f32
    %29 = vector.broadcast %cst_9 : f32 to vector<8x16xf32>
    %30 = arith.mulf %29, %19 : vector<8x16xf32>
    %31 = arith.subf %28, %30 : vector<8x16xf32>
    %cst_10 = arith.constant 0.000000e+00 : f32
    %32 = vector.broadcast %cst_10 : f32 to vector<8x16xf32>
    %33 = arith.maximumf %31, %32 : vector<8x16xf32>
    %cst_11 = arith.constant -2.000000e+00 : f32
    %34 = vector.broadcast %cst_11 : f32 to vector<8x16xf32>
    %35 = arith.mulf %34, %33 : vector<8x16xf32>
    %36 = math.exp %35 : vector<8x16xf32>
    %c0_12 = arith.constant 0 : index
    %c0_13 = arith.constant 0 : index
    %37 = vector.load %arg3[%c0_12, %c0_13] : memref<20x5xf32, #tpu.memory_space<vmem>>, vector<16x5xf32>
    %cst_14 = arith.constant dense<0.000000e+00> : vector<8x5xf32>
    %38 = tpu.matmul %36, %37, %cst_14 {dimension_numbers = #tpu.dot_dimension_numbers<[1], [0], [0], [1], [0, 0, 1, 1], [], []>} : vector<8x16xf32>, vector<16x5xf32>, vector<8x5xf32> -> vector<8x5xf32>
    %c16 = arith.constant 16 : index
    %c0_15 = arith.constant 0 : index
    %39 = vector.load %arg3[%c16, %c0_15] : memref<20x5xf32, #tpu.memory_space<vmem>>, vector<4x5xf32>
    %cst_16 = arith.constant dense<0.000000e+00> : vector<8x5xf32>
    %40 = tpu.matmul %11, %39, %cst_16 {dimension_numbers = #tpu.dot_dimension_numbers<[1], [0], [0], [1], [0, 0, 1, 1], [], []>} : vector<8x4xf32>, vector<4x5xf32>, vector<8x5xf32> -> vector<8x5xf32>
    %41 = arith.addf %38, %40 : vector<8x5xf32>
    %c0_17 = arith.constant 0 : index
    %c0_18 = arith.constant 0 : index
    %42 = vector.load %arg4[%c0_17, %c0_18] : memref<8x5xf32, #tpu.memory_space<vmem>>, vector<8x5xf32>
    tpu.vector_store %arg4[%c0_17, %c0_18], %41 {strides = array<i32>} : memref<8x5xf32, #tpu.memory_space<vmem>>, vector<8x5xf32>,
    return
  }
}

</mosaic_0001>

<bundles_post_ra>
// kernel: tpu_custom_call.1
= control target key start
LH: loop header
LB: loop body
LE: loop exit
PB: predicated region body
PF: predicated region fallthrough
CT: control target
= control target key end

     0   :  { %vm40_vm0 = vcmask 1043456   ;;  %v23_v2 = vlaneseq  ;;  %s246_s0 = inlined_call_operand.vmem [shape: f32[8,4], index: 0, kind: input, shape index: {}]   ;;  %s247_s1 = inlined_call_operand.vmem [shape: f32[2,4], index: 1, kind: input, shape index: {}]   ;;  %s248_s2 = inlined_call_operand.vmem [shape: f32[4,16], index: 2, kind: input, shape index: {}]   ;;  %s249_s3 = inlined_call_operand.vmem [shape: f32[20,5], index: 3, kind: input, shape index: {}]   ;;  %s250_s4 = inlined_call_operand.hbm [shape: f32[8,5], index: 4, kind: output, shape index: {}]  }
   0x1   :  { %v35_v0 = vld [vmem:[%s248_s2] sm:$0xf] }
   0x2   :  { %v18_v1 = vld [vmem:[%s246_s0] sm:$0xff]  ;;  %155 = vmatpush.msk.msra.mxu0 %vm40_vm0, %v35_v0  ;;  %v24_v5 = vand.u32 127, %v23_v2 }
   0x3   :  { %vm19_vm1 = vcmp.ge.f32.partialorder %v18_v1, 0.0  ;;  %v20_v3 = vfloor.f32 %v18_v1  ;;  %v21_v4 = vceil.f32 %v18_v1  ;;  %v161_v6 = vld [vmem:[%s247_s1] ss:$0 sm:$0xff] }
   0x5   :  { %v22_v7 = vsel %vm19_vm1, %v20_v3, %v21_v4 }
   0x6   :  { %9 = vsyncpa [#allocation3], 0  ;;  %vm25_vm2 = vcmp.eq.s32.totalorder %v24_v5, 0  ;;  %v162_v8 = vld [vmem:[%s247_s1 + $0x1] ss:$0 sm:$0xff]  ;;  %vm36_vm3 = vcmask 31744   ;;  %v68_v14 = vmul.f32 %v35_v0, %v35_v0 }
   0x7   :  { %v28_v9 = vsel %vm25_vm2, %v22_v7, %v18_v1  ;;  %vm69_vm4 = vcmask 125952   ;;  %v85_v18 = vld [vmem:[%s249_s3 + $0x8] sm:$0xff]  ;;  %v84_v19 = vld [vmem:[%s249_s3] sm:$0xff]  ;;  %v86_v21 = vld [vmem:[%s249_s3 + $0x10] sm:$0xf]  ;;  %vm113_vm5 = vcmask 130048  }
   0x8   :  { %v32_v10 = vsub.f32 %v28_v9, %v161_v6  ;;  %v70_v15 = vsel %vm69_vm4, %v68_v14, 0.0  ;;  %131 = vmatpush.msra.mxu2 %v85_v18  ;;  %157 = vmatpush.msk.msra.mxu1 %vm40_vm0, %v86_v21  ;;  %s191_s3 = smov [#allocation2]   ;;  %s146_s29 = sshll.u32 %s250_s4, 4  ;;  %vm137_vm6 = vcmask 39936   ;;  %s147_s29 = int_to_ptr.hbm [resolvable:$true] %s146_s29 }
   0x9   :  { %v71_v16 = vrot.slane %v70_v15, 4  ;;  %158 = vmatmul.msk.f32.vlgmr.msra.gmra.mxu1 %vm36_vm3, %v28_v9  ;;  %s144_s26 = sshll.u32 %s191_s3, 4  ;;  %s145_s26 = int_to_ptr.vmem [resolvable:$true] %s144_s26 }
   0xa   :  { %v34_v11 = vmul.f32 %v162_v8, %v32_v10  ;;  %132 = vmatpush.msra.mxu2 %v84_v19 }
   0xb   :  { %v72_v17 = vadd.f32 %v71_v16, %v70_v15 }
   0xc   :  { %156 = vmatmul.msk.f32.vlgmr.msra.gmra.mxu0 %vm36_vm3, %v34_v11  ;;  %v64_v12 = vmul.f32 %v34_v11, %v34_v11 }
   0xd   :  { %v73_v20 = vrot.slane %v72_v17, 2 }
   0xe   :  { %v65_v13 = vsel %vm36_vm3, %v64_v12, 0.0 }
   0xf   :  { %66 = vadd.xlane.f32.xlu0 %v65_v13  ;;  %v74_v22 = vadd.f32 %v73_v20, %v72_v17 }
  0x11   :  { %v75_v23 = vrot.slane %v74_v22, 1 }
  0x13   :  { %v76_v24 = vadd.f32 %v75_v23, %v74_v22 }
  0x82   :  { %v67_v25 = vpop.xlane.xlu0 %66 }
  0x83   :  { %v77_v26 = vadd.f32 %v76_v24, %v67_v25 }
  0x86   :  { %v110_v34 = vpop.f32.mrf.mxu1 }
  0x89   :  { %v61_v27 = vpop.f32.mrf.mxu0 }
  0x8a   :  { %v78_v28 = vmul.f32 2.0, %v61_v27 }
  0x8c   :  { %v79_v29 = vsub.f32 %v77_v26, %v78_v28 }
  0x8e   :  { %v80_v30 = vmax.f32 %v79_v29, 0.0 }
  0x90   :  { %v81_v31 = vmul.f32 -2.0, %v80_v30 }
  0x92   :  { %v82_v32 = vmul.f32 1.442695, %v81_v31 }
  0x94   :  { %163 = vpow2.f32 %v82_v32 }
  0x9a   :  { %v164_v33 = vpop.eup %163 }
  0x9b   :  { %159 = vmatmul.msk.f32.vlgmr.msra.gmra.mxu2 %vm113_vm5, %v164_v33 }
 0x11e   :  { %v134_v35 = vpop.f32.mrf.mxu2 }
 0x11f   :  { %v135_v36 = vadd.f32 %v134_v35, %v110_v34 }
 0x121   :  { %138 = vst.msk [vmem:[#allocation2] sm:$0xff] %vm137_vm6, %v135_v36 }
 0x122   :  { %149 = dma.vmem_to_hbm [thread:$0]  %s145_s26, 128, %s147_s29, [#allocation3]  }
 0x123   :  { %189 = dma.done.wait [#allocation3], 128  }
 0x124   :  { %190 = vsyncadd [#allocation3], 4294967168 }
 0x125   :  { %154 = vsyncpa [#allocation3], 1 }

</bundles_post_ra>
